<compile_context>
chip_gen: v7x
topology: tpu7x:2x2x1
jax: 0.10.0
libtpu: 0.0.40
codegen_flags: <defaults>
</compile_context>

<pallas_src>
import jax
import jax.numpy as jnp
from jax.experimental import pallas as pl
from jax.experimental.pallas import tpu as pltpu

LANE = 128


def _round_up(x, m):
    return ((x + m - 1) // m) * m


# --------------------------------------------------------------------------
# Kernel: fused 4-layer MLP on one (TB, K_pad) batch tile.
# bf16 MXU operands, f32 accumulation; bias-add / ReLU on the VPU in f32;
# final store is bf16 on a lane-dense 128-wide padded output.
# --------------------------------------------------------------------------
def _mlp_kernel(x_ref,
                w1_ref, b1_ref,
                w2_ref, b2_ref,
                w3_ref, b3_ref,
                w4_ref, b4_ref,
                o_ref):
    x = x_ref[...]  # bf16 (TB, K_pad)

    h1 = jnp.dot(x, w1_ref[...], preferred_element_type=jnp.float32) + b1_ref[...]
    h1 = jnp.maximum(h1, 0.0)

    h2 = jnp.dot(h1.astype(jnp.bfloat16), w2_ref[...],
                 preferred_element_type=jnp.float32) + b2_ref[...]
    h2 = jnp.maximum(h2, 0.0)

    h3 = jnp.dot(h2.astype(jnp.bfloat16), w3_ref[...],
                 preferred_element_type=jnp.float32) + b3_ref[...]
    h3 = jnp.maximum(h3, 0.0)

    out = jnp.dot(h3.astype(jnp.bfloat16), w4_ref[...],
                  preferred_element_type=jnp.float32) + b4_ref[...]
    o_ref[...] = out.astype(o_ref.dtype)  # bf16, lane-dense unmasked store


# --------------------------------------------------------------------------
# One-time parameter preprocessing (pad to lane-aligned shapes + bf16 cast).
# Keep this OUT of the per-forward hot path.
# --------------------------------------------------------------------------
def prepare_params(params, input_size):
    H1 = params["w1"].shape[1]          # 256
    H2 = params["w2"].shape[1]          # 128
    H3 = params["w3"].shape[1]          # 64
    C = params["w4"].shape[1]           # num_classes

    K_pad = _round_up(input_size, LANE)
    H3_pad = _round_up(H3, LANE)
    C_pad = _round_up(C, LANE)

    w1 = jnp.zeros((K_pad, H1), jnp.bfloat16).at[:input_size, :].set(
        params["w1"].astype(jnp.bfloat16))
    w2 = params["w2"].astype(jnp.bfloat16)
    w3 = jnp.zeros((H2, H3_pad), jnp.bfloat16).at[:, :H3].set(
        params["w3"].astype(jnp.bfloat16))
    w4 = jnp.zeros((H3_pad, C_pad), jnp.bfloat16).at[:H3, :C].set(
        params["w4"].astype(jnp.bfloat16))

    # Biases stay f32: they are added to the f32 accumulator.
    b1 = params["b1"].reshape(1, H1).astype(jnp.float32)
    b2 = params["b2"].reshape(1, H2).astype(jnp.float32)
    b3 = jnp.zeros((1, H3_pad), jnp.float32).at[:, :H3].set(
        params["b3"].reshape(1, H3))
    b4 = jnp.zeros((1, C_pad), jnp.float32).at[:, :C].set(
        params["b4"].reshape(1, C))

    meta = dict(K=input_size, K_pad=K_pad, H1=H1, H2=H2,
                H3_pad=H3_pad, C=C, C_pad=C_pad)
    return dict(w1=w1, b1=b1, w2=w2, b2=b2, w3=w3, b3=b3, w4=w4, b4=b4), meta


# --------------------------------------------------------------------------
# Batch tiling: round B up to 128 first, then pick the largest TB <= cap that
# divides B_pad, keeping >= 2 grid steps when possible (v7x has 2 TCs).
# --------------------------------------------------------------------------
def _choose_batch_tiling(B, cap=2048):
    B_pad = _round_up(max(B, 1), LANE)
    n_chunks = B_pad // LANE
    cap_chunks = max(1, cap // LANE)

    best = 1
    for d in range(1, n_chunks + 1):
        if d > cap_chunks:
            break
        if n_chunks % d:
            continue
        steps = n_chunks // d
        if n_chunks >= 2 and steps < 2:
            continue  # keep at least 2 grid steps so both v7x TCs get work
        best = d
    return best * LANE, B_pad


def severity_classifier_forward(x, prepared, meta, *, max_tb=2048):
    """x: (B, input_size) float32. Returns (B, num_classes) float32 logits."""
    B, K = x.shape
    assert K == meta["K"], "input_size mismatch with prepared params"
    K_pad, H1, H2 = meta["K_pad"], meta["H1"], meta["H2"]
    H3_pad, C, C_pad = meta["H3_pad"], meta["C"], meta["C_pad"]

    w1, b1 = prepared["w1"], prepared["b1"]
    w2, b2 = prepared["w2"], prepared["b2"]
    w3, b3 = prepared["w3"], prepared["b3"]
    w4, b4 = prepared["w4"], prepared["b4"]

    TB, B_pad = _choose_batch_tiling(B, cap=max_tb)

    # Pad x directly in bf16 -- no f32 padded intermediate in HBM.
    x_p = jnp.zeros((B_pad, K_pad), jnp.bfloat16).at[:B, :K].set(
        x.astype(jnp.bfloat16))

    grid = (B_pad // TB,)

    def const_map(i):
        return (0, 0)

    in_specs = [
        pl.BlockSpec((TB, K_pad), lambda i: (i, 0)),     # x tile, pipelined
        pl.BlockSpec((K_pad, H1), const_map),            # weights: VMEM-resident
        pl.BlockSpec((1, H1), const_map),
        pl.BlockSpec((H1, H2), const_map),
        pl.BlockSpec((1, H2), const_map),
        pl.BlockSpec((H2, H3_pad), const_map),
        pl.BlockSpec((1, H3_pad), const_map),
        pl.BlockSpec((H3_pad, C_pad), const_map),
        pl.BlockSpec((1, C_pad), const_map),
    ]
    out_specs = pl.BlockSpec((TB, C_pad), lambda i: (i, 0))

    flops = 2 * B_pad * (K_pad * H1 + H1 * H2 + H2 * H3_pad + H3_pad * C_pad)
    bytes_accessed = (
        x_p.size * 2
        + (w1.size + w2.size + w3.size + w4.size) * 2
        + (b1.size + b2.size + b3.size + b4.size) * 4
        + B_pad * C_pad * 2                              # bf16 output write
    )

    out_padded = pl.pallas_call(
        _mlp_kernel,
        out_shape=jax.ShapeDtypeStruct((B_pad, C_pad), jnp.bfloat16),
        grid=grid,
        in_specs=in_specs,
        out_specs=out_specs,
        compiler_params=pltpu.CompilerParams(
            dimension_semantics=("parallel",),
            vmem_limit_bytes=32 * 1024 * 1024),
        cost_estimate=pl.CostEstimate(
            flops=flops, transcendentals=0, bytes_accessed=bytes_accessed),
    )(x_p, w1, b1, w2, b2, w3, b3, w4, b4)

    return out_padded[:B, :C].astype(jnp.float32)


# --------------------------------------------------------------------------
# Synthetic init + pure-JAX f32 reference.
# --------------------------------------------------------------------------
def init_params(key, input_size, num_classes=4):
    """Deterministic synthetic init (uniform, nn.Linear-style fan-in scaling)."""
    dims = [(input_size, 256), (256, 128), (128, 64), (64, num_classes)]
    params = {}
    for i, (fan_in, fan_out) in enumerate(dims, start=1):
        key, kw, kb = jax.random.split(key, 3)
        bound = 1.0 / jnp.sqrt(float(fan_in))
        params[f"w{i}"] = jax.random.uniform(
            kw, (fan_in, fan_out), jnp.float32, -bound, bound)
        params[f"b{i}"] = jax.random.uniform(
            kb, (1, fan_out), jnp.float32, -bound, bound)
    return params


def reference_forward(x, params):
    h = x
    for i in range(1, 4):
        h = jnp.maximum(h @ params[f"w{i}"] + params[f"b{i}"], 0.0)
    return h @ params["w4"] + params["b4"]


if __name__ == "__main__":
    key = jax.random.PRNGKey(0)
    k_x, k_p = jax.random.split(key)

    batch, input_size, num_classes = 2, 32, 4
    x = jax.random.normal(k_x, (batch, input_size), jnp.float32)
    params = init_params(k_p, input_size, num_classes)

    prepared, meta = prepare_params(params, input_size)   # one-time prep
    out = severity_classifier_forward(x, prepared, meta)
    out = jax.block_until_ready(out)

    ref = reference_forward(x, params)
    assert out.shape == (batch, num_classes)
    # bf16 matmul operands + bf16 output store vs. f32 reference -> loose tol.
    assert jnp.allclose(out, ref, atol=5e-2, rtol=5e-2), (
        f"max abs diff {jnp.max(jnp.abs(out - ref))}")

    print("KERNEL_OK")
</pallas_src>

<mosaic_0001>
module attributes {stable_mosaic.version = 11 : i64} {
  func.func @_mlp_kernel(%arg0: i32, %arg1: memref<128x128xbf16, #tpu.memory_space<vmem>>, %arg2: memref<128x256xbf16, #tpu.memory_space<vmem>>, %arg3: memref<1x256xf32, #tpu.memory_space<vmem>>, %arg4: memref<256x128xbf16, #tpu.memory_space<vmem>>, %arg5: memref<1x128xf32, #tpu.memory_space<vmem>>, %arg6: memref<128x128xbf16, #tpu.memory_space<vmem>>, %arg7: memref<1x128xf32, #tpu.memory_space<vmem>>, %arg8: memref<128x128xbf16, #tpu.memory_space<vmem>>, %arg9: memref<1x128xf32, #tpu.memory_space<vmem>>, %arg10: memref<128x128xbf16, #tpu.memory_space<vmem>>) attributes {dimension_semantics = [#tpu.dimension_semantics<parallel>], iteration_bounds = array<i64: 1>, scalar_prefetch = 0 : i64, scratch_operands = 0 : i64, tpu.core_type = #tpu.core_type<tc>, window_params = [{transform_indices = @transform_0, window_bounds = array<i64: 128, 128>}, {pipeline_mode = #tpu.pipeline_mode<synchronous>, transform_indices = @transform_1, window_bounds = array<i64: 128, 256>}, {pipeline_mode = #tpu.pipeline_mode<synchronous>, transform_indices = @transform_2, window_bounds = array<i64: 1, 256>}, {pipeline_mode = #tpu.pipeline_mode<synchronous>, transform_indices = @transform_3, window_bounds = array<i64: 256, 128>}, {pipeline_mode = #tpu.pipeline_mode<synchronous>, transform_indices = @transform_4, window_bounds = array<i64: 1, 128>}, {pipeline_mode = #tpu.pipeline_mode<synchronous>, transform_indices = @transform_5, window_bounds = array<i64: 128, 128>}, {pipeline_mode = #tpu.pipeline_mode<synchronous>, transform_indices = @transform_6, window_bounds = array<i64: 1, 128>}, {pipeline_mode = #tpu.pipeline_mode<synchronous>, transform_indices = @transform_7, window_bounds = array<i64: 128, 128>}, {pipeline_mode = #tpu.pipeline_mode<synchronous>, transform_indices = @transform_8, window_bounds = array<i64: 1, 128>}, {transform_indices = @transform_9, window_bounds = array<i64: 128, 128>}]} {
    %c0 = arith.constant 0 : index
    %c0_0 = arith.constant 0 : index
    %0 = vector.load %arg1[%c0, %c0_0] : memref<128x128xbf16, #tpu.memory_space<vmem>>, vector<128x128xbf16>
    %c0_1 = arith.constant 0 : index
    %c0_2 = arith.constant 0 : index
    %1 = vector.load %arg2[%c0_1, %c0_2] : memref<128x256xbf16, #tpu.memory_space<vmem>>, vector<128x256xbf16>
    %cst = arith.constant dense<0.000000e+00> : vector<128x256xf32>
    %2 = tpu.matmul %0, %1, %cst {dimension_numbers = #tpu.dot_dimension_numbers<[1], [0], [0], [1], [0, 0, 1, 1], [], []>} : vector<128x128xbf16>, vector<128x256xbf16>, vector<128x256xf32> -> vector<128x256xf32>
    %c0_3 = arith.constant 0 : index
    %c0_4 = arith.constant 0 : index
    %3 = vector.load %arg3[%c0_3, %c0_4] : memref<1x256xf32, #tpu.memory_space<vmem>>, vector<1x256xf32>
    %4 = vector.broadcast %3 : vector<1x256xf32> to vector<128x256xf32>
    %5 = arith.addf %2, %4 : vector<128x256xf32>
    %cst_5 = arith.constant 0.000000e+00 : f32
    %6 = vector.broadcast %cst_5 : f32 to vector<128x256xf32>
    %7 = arith.maximumf %5, %6 : vector<128x256xf32>
    %8 = arith.truncf %7 : vector<128x256xf32> to vector<128x256xbf16>
    %c0_6 = arith.constant 0 : index
    %c0_7 = arith.constant 0 : index
    %9 = vector.load %arg4[%c0_6, %c0_7] : memref<256x128xbf16, #tpu.memory_space<vmem>>, vector<256x128xbf16>
    %cst_8 = arith.constant dense<0.000000e+00> : vector<128x128xf32>
    %10 = tpu.matmul %8, %9, %cst_8 {dimension_numbers = #tpu.dot_dimension_numbers<[1], [0], [0], [1], [0, 0, 1, 1], [], []>} : vector<128x256xbf16>, vector<256x128xbf16>, vector<128x128xf32> -> vector<128x128xf32>
    %c0_9 = arith.constant 0 : index
    %c0_10 = arith.constant 0 : index
    %11 = vector.load %arg5[%c0_9, %c0_10] : memref<1x128xf32, #tpu.memory_space<vmem>>, vector<1x128xf32>
    %12 = vector.broadcast %11 : vector<1x128xf32> to vector<128x128xf32>
    %13 = arith.addf %10, %12 : vector<128x128xf32>
    %cst_11 = arith.constant 0.000000e+00 : f32
    %14 = vector.broadcast %cst_11 : f32 to vector<128x128xf32>
    %15 = arith.maximumf %13, %14 : vector<128x128xf32>
    %16 = arith.truncf %15 : vector<128x128xf32> to vector<128x128xbf16>
    %c0_12 = arith.constant 0 : index
    %c0_13 = arith.constant 0 : index
    %17 = vector.load %arg6[%c0_12, %c0_13] : memref<128x128xbf16, #tpu.memory_space<vmem>>, vector<128x128xbf16>
    %cst_14 = arith.constant dense<0.000000e+00> : vector<128x128xf32>
    %18 = tpu.matmul %16, %17, %cst_14 {dimension_numbers = #tpu.dot_dimension_numbers<[1], [0], [0], [1], [0, 0, 1, 1], [], []>} : vector<128x128xbf16>, vector<128x128xbf16>, vector<128x128xf32> -> vector<128x128xf32>
    %c0_15 = arith.constant 0 : index
    %c0_16 = arith.constant 0 : index
    %19 = vector.load %arg7[%c0_15, %c0_16] : memref<1x128xf32, #tpu.memory_space<vmem>>, vector<1x128xf32>
    %20 = vector.broadcast %19 : vector<1x128xf32> to vector<128x128xf32>
    %21 = arith.addf %18, %20 : vector<128x128xf32>
    %cst_17 = arith.constant 0.000000e+00 : f32
    %22 = vector.broadcast %cst_17 : f32 to vector<128x128xf32>
    %23 = arith.maximumf %21, %22 : vector<128x128xf32>
    %24 = arith.truncf %23 : vector<128x128xf32> to vector<128x128xbf16>
    %c0_18 = arith.constant 0 : index
    %c0_19 = arith.constant 0 : index
    %25 = vector.load %arg8[%c0_18, %c0_19] : memref<128x128xbf16, #tpu.memory_space<vmem>>, vector<128x128xbf16>
    %cst_20 = arith.constant dense<0.000000e+00> : vector<128x128xf32>
    %26 = tpu.matmul %24, %25, %cst_20 {dimension_numbers = #tpu.dot_dimension_numbers<[1], [0], [0], [1], [0, 0, 1, 1], [], []>} : vector<128x128xbf16>, vector<128x128xbf16>, vector<128x128xf32> -> vector<128x128xf32>
    %c0_21 = arith.constant 0 : index
    %c0_22 = arith.constant 0 : index
    %27 = vector.load %arg9[%c0_21, %c0_22] : memref<1x128xf32, #tpu.memory_space<vmem>>, vector<1x128xf32>
    %28 = vector.broadcast %27 : vector<1x128xf32> to vector<128x128xf32>
    %29 = arith.addf %26, %28 : vector<128x128xf32>
    %30 = arith.truncf %29 : vector<128x128xf32> to vector<128x128xbf16>
    %c0_23 = arith.constant 0 : index
    %c0_24 = arith.constant 0 : index
    %31 = vector.load %arg10[%c0_23, %c0_24] : memref<128x128xbf16, #tpu.memory_space<vmem>>, vector<128x128xbf16>
    tpu.vector_store %arg10[%c0_23, %c0_24], %30 {strides = array<i32>} : memref<128x128xbf16, #tpu.memory_space<vmem>>, vector<128x128xbf16>,
    return
  }
  func.func @transform_0(%arg0: i32) -> (i32, i32) {
    %c0_i32 = arith.constant 0 : i32
    %c0_i32_0 = arith.constant 0 : i32
    return %arg0, %c0_i32 : i32, i32
  }
  func.func @transform_1(%arg0: i32) -> (i32, i32) {
    %c0_i32 = arith.constant 0 : i32
    %c0_i32_0 = arith.constant 0 : i32
    %c0_i32_1 = arith.constant 0 : i32
    return %c0_i32, %c0_i32_0 : i32, i32
  }
  func.func @transform_2(%arg0: i32) -> (i32, i32) {
    %c0_i32 = arith.constant 0 : i32
    %c0_i32_0 = arith.constant 0 : i32
    %c0_i32_1 = arith.constant 0 : i32
    return %c0_i32, %c0_i32_0 : i32, i32
  }
  func.func @transform_3(%arg0: i32) -> (i32, i32) {
    %c0_i32 = arith.constant 0 : i32
    %c0_i32_0 = arith.constant 0 : i32
    %c0_i32_1 = arith.constant 0 : i32
    return %c0_i32, %c0_i32_0 : i32, i32
  }
  func.func @transform_4(%arg0: i32) -> (i32, i32) {
    %c0_i32 = arith.constant 0 : i32
    %c0_i32_0 = arith.constant 0 : i32
    %c0_i32_1 = arith.constant 0 : i32
    return %c0_i32, %c0_i32_0 : i32, i32
  }
  func.func @transform_5(%arg0: i32) -> (i32, i32) {
    %c0_i32 = arith.constant 0 : i32
    %c0_i32_0 = arith.constant 0 : i32
    %c0_i32_1 = arith.constant 0 : i32
    return %c0_i32, %c0_i32_0 : i32, i32
  }
  func.func @transform_6(%arg0: i32) -> (i32, i32) {
    %c0_i32 = arith.constant 0 : i32
    %c0_i32_0 = arith.constant 0 : i32
    %c0_i32_1 = arith.constant 0 : i32
    return %c0_i32, %c0_i32_0 : i32, i32
  }
  func.func @transform_7(%arg0: i32) -> (i32, i32) {
    %c0_i32 = arith.constant 0 : i32
    %c0_i32_0 = arith.constant 0 : i32
    %c0_i32_1 = arith.constant 0 : i32
    return %c0_i32, %c0_i32_0 : i32, i32
  }
  func.func @transform_8(%arg0: i32) -> (i32, i32) {
    %c0_i32 = arith.constant 0 : i32
    %c0_i32_0 = arith.constant 0 : i32
    %c0_i32_1 = arith.constant 0 : i32
    return %c0_i32, %c0_i32_0 : i32, i32
  }
  func.func @transform_9(%arg0: i32) -> (i32, i32) {
    %c0_i32 = arith.constant 0 : i32
    %c0_i32_0 = arith.constant 0 : i32
    return %arg0, %c0_i32 : i32, i32
  }
}

</mosaic_0001>

<bundles_post_ra>
// kernel: tpu_custom_call.1
= control target key start
LH: loop header
LB: loop body
LE: loop exit
PB: predicated region body
PF: predicated region fallthrough
CT: control target
= control target key end

     0   :  { %14 = vsyncpa [#allocation3], 0  ;;  %s1885_s0 = inlined_call_operand.hbm [shape: bf16[128,128], index: 0, kind: input, shape index: {}]   ;;  %s1886_s1 = inlined_call_operand.hbm [shape: bf16[128,256], index: 1, kind: input, shape index: {}]   ;;  %s1887_s2 = inlined_call_operand.vmem [shape: f32[1,256], index: 2, kind: input, shape index: {}]   ;;  %s1888_s3 = inlined_call_operand.hbm [shape: bf16[256,128], index: 3, kind: input, shape index: {}]   ;;  %s1889_s4 = inlined_call_operand.vmem [shape: f32[1,128], index: 4, kind: input, shape index: {}]   ;;  %s1890_s5 = inlined_call_operand.hbm [shape: bf16[128,128], index: 5, kind: input, shape index: {}]   ;;  %s1891_s6 = inlined_call_operand.vmem [shape: f32[1,128], index: 6, kind: input, shape index: {}]   ;;  %s1892_s7 = inlined_call_operand.hbm [shape: bf16[128,128], index: 7, kind: input, shape index: {}]   ;;  %s1893_s8 = inlined_call_operand.vmem [shape: f32[1,128], index: 8, kind: input, shape index: {}]   ;;  %s1894_s9 = inlined_call_operand.hbm [shape: bf16[128,128], index: 9, kind: output, shape index: {}]  }
   0x1   :  { %15 = vsyncpa [#allocation6], 0 }
   0x2   :  { %16 = vsyncpa [#allocation9], 0 }
   0x3   :  { %17 = vsyncpa [#allocation4], 0  ;;  %s1663_s30 = smov [#allocation5]   ;;  %s1523_s13 = scalar_lea.hbm %s1886_s1, 2048 }
   0x4   :  { %s35_s10 = sshll.u32 %s1663_s30, 4  ;;  %p1524_p0 = scmp.ne.s32.totalorder %s1886_s1, %s1523_s13  ;;  %s36_s10 = int_to_ptr.vmem [resolvable:$true] %s35_s10 }
   0x5   :  { %p1527_p1 = scmp.lt.u32.totalorder %s1523_s13, %s1886_s1 }
   0x7   :  { %p1529_p2 = pnand %p1527_p1, %p1524_p0 }
   0x9   :  { %1532 = shalt.err (!%p1529_p2)
}
   0xa   :  { %s1533_s18 = scalar_lea.vmem %s36_s10, 2048  ;;  %p1538_p4 = scmp.lt.s32.totalorder %s36_s10, %s36_s10 }
   0xb   :  { %p1534_p3 = scmp.ne.s32.totalorder %s36_s10, %s1533_s18  ;;  %p1539_p5 = scmp.lt.s32.totalorder %s1533_s18, %s1533_s18 }
   0xd   :  { %p1540_p6 = por %p1539_p5, %p1538_p4 }
   0xf   :  { %p1541_p7 = pnand %p1540_p6, %p1534_p3 }
  0x11   :  { %1544 = shalt.err (!%p1541_p7)
}
  0x12   :  { %s1664_s19 = smov 128   ;;  %s1665_s20 = smov 8  }
  0x13   :  { %41 = dma.hbm_to_vmem [thread:$0]  %s1886_s1, 2048, %s36_s10, [#allocation6], %s1664_s19, %s1664_s19, %s1665_s20  }
  0x14   :  { %s1666_s23 = smov [#allocation8]   ;;  %s1667_s25 = smov [#allocation2]  }
  0x15   :  { %s63_s24 = sshll.u32 %s1666_s23, 4  ;;  %s23_s26 = sshll.u32 %s1667_s25, 4  ;;  %s64_s24 = int_to_ptr.vmem [resolvable:$true] %s63_s24  ;;  %s24_s26 = int_to_ptr.vmem [resolvable:$true] %s23_s26 }
  0x16   :  { %s1545_s29 = scalar_lea.hbm %s1890_s5, 1024 }
  0x17   :  { %p1546_p8 = scmp.ne.s32.totalorder %s1890_s5, %s1545_s29  ;;  %p1549_p9 = scmp.lt.u32.totalorder %s1545_s29, %s1890_s5 }
  0x19   :  { %p1551_p10 = pnand %p1549_p9, %p1546_p8 }
  0x1b   :  { %1554 = shalt.err (!%p1551_p10)
}
  0x1c   :  { %s1555_s1 = scalar_lea.vmem %s64_s24, 1024  ;;  %p1560_p12 = scmp.lt.s32.totalorder %s64_s24, %s64_s24 }
  0x1d   :  { %p1556_p11 = scmp.ne.s32.totalorder %s64_s24, %s1555_s1  ;;  %p1561_p13 = scmp.lt.s32.totalorder %s1555_s1, %s1555_s1 }
  0x1f   :  { %p1562_p0 = por %p1561_p13, %p1560_p12 }
  0x21   :  { %p1563_p1 = pnand %p1562_p0, %p1556_p11 }
  0x23   :  { %1566 = shalt.err (!%p1563_p1)
}
  0x24   :  { %s1668_s10 = smov 64   ;;  %s1669_s14 = smov 4  }
  0x25   :  { %69 = dma.hbm_to_vmem [thread:$0]  %s1890_s5, 1024, %s64_s24, [#allocation9], %s1668_s10, %s1668_s10, %s1669_s14  }
  0x26   :  { %s1567_s19 = scalar_lea.hbm %s1885_s0, 1024 }
  0x27   :  { %p1568_p2 = scmp.ne.s32.totalorder %s1885_s0, %s1567_s19  ;;  %p1571_p3 = scmp.lt.u32.totalorder %s1567_s19, %s1885_s0 }
  0x29   :  { %p1573_p4 = pnand %p1571_p3, %p1568_p2 }
  0x2b   :  { %1576 = shalt.err (!%p1573_p4)
}
  0x2c   :  { %s1577_s25 = scalar_lea.vmem %s24_s26, 1024  ;;  %p1582_p6 = scmp.lt.s32.totalorder %s24_s26, %s24_s26 }
  0x2d   :  { %p1578_p5 = scmp.ne.s32.totalorder %s24_s26, %s1577_s25  ;;  %p1583_p7 = scmp.lt.s32.totalorder %s1577_s25, %s1577_s25 }
  0x2f   :  { %p1584_p8 = por %p1583_p7, %p1582_p6 }
  0x31   :  { %p1585_p9 = pnand %p1584_p8, %p1578_p5 }
  0x33   :  { %1588 = shalt.err (!%p1585_p9)
}
  0x34   :  { %29 = dma.hbm_to_vmem [thread:$0]  %s1885_s0, 1024, %s24_s26, [#allocation3], %s1668_s10, %s1668_s10, %s1669_s14  }
  0x35   :  { %s1670_s27 = smov [#allocation7]   ;;  %s1671_s29 = smov [#allocation10]  }
  0x36   :  { %s49_s28 = sshll.u32 %s1670_s27, 4  ;;  %s77_s30 = sshll.u32 %s1671_s29, 4  ;;  %s50_s28 = int_to_ptr.vmem [resolvable:$true] %s49_s28  ;;  %s78_s30 = int_to_ptr.vmem [resolvable:$true] %s77_s30 }
  0x37   :  { %s1589_s13 = scalar_lea.hbm %s1888_s3, 2048 }
  0x38   :  { %p1590_p10 = scmp.ne.s32.totalorder %s1888_s3, %s1589_s13  ;;  %p1593_p11 = scmp.lt.u32.totalorder %s1589_s13, %s1888_s3 }
  0x3a   :  { %p1595_p12 = pnand %p1593_p11, %p1590_p10 }
  0x3c   :  { %1598 = shalt.err (!%p1595_p12)
}
  0x3d   :  { %s1599_s0 = scalar_lea.vmem %s50_s28, 2048  ;;  %p1604_p0 = scmp.lt.s32.totalorder %s50_s28, %s50_s28 }
  0x3e   :  { %p1600_p13 = scmp.ne.s32.totalorder %s50_s28, %s1599_s0  ;;  %p1605_p1 = scmp.lt.s32.totalorder %s1599_s0, %s1599_s0 }
  0x40   :  { %p1606_p2 = por %p1605_p1, %p1604_p0 }
  0x42   :  { %p1607_p3 = pnand %p1606_p2, %p1600_p13 }
  0x44   :  { %1610 = shalt.err (!%p1607_p3)
}
  0x45   :  { %55 = dma.hbm_to_vmem [thread:$0]  %s1888_s3, 2048, %s50_s28, [#allocation6], %s1668_s10, %s1668_s10, %s1669_s14  }
  0x46   :  { %s1611_s21 = scalar_lea.hbm %s1892_s7, 1024 }
  0x47   :  { %p1612_p4 = scmp.ne.s32.totalorder %s1892_s7, %s1611_s21  ;;  %p1615_p5 = scmp.lt.u32.totalorder %s1611_s21, %s1892_s7 }
  0x49   :  { %p1617_p6 = pnand %p1615_p5, %p1612_p4 }
  0x4b   :  { %1620 = shalt.err (!%p1617_p6)
}
  0x4c   :  { %s1621_s24 = scalar_lea.vmem %s78_s30, 1024  ;;  %p1626_p8 = scmp.lt.s32.totalorder %s78_s30, %s78_s30 }
  0x4d   :  { %p1622_p7 = scmp.ne.s32.totalorder %s78_s30, %s1621_s24  ;;  %p1627_p9 = scmp.lt.s32.totalorder %s1621_s24, %s1621_s24 }
  0x4f   :  { %p1628_p10 = por %p1627_p9, %p1626_p8 }
  0x51   :  { %p1629_p11 = pnand %p1628_p10, %p1622_p7 }
  0x53   :  { %1632 = shalt.err (!%p1629_p11)
}
  0x54   :  { %83 = dma.hbm_to_vmem [thread:$0]  %s1892_s7, 1024, %s78_s30, [#allocation9], %s1668_s10, %s1668_s10, %s1669_s14  }
  0x55   :  { %1655 = dma.done.wait [#allocation3], 1024  }
  0x56   :  { %1656 = vsyncadd [#allocation3], 4294966272 }
  0x57   :  { %1657 = dma.done.wait [#allocation6], 4096  }
  0x58   :  { %1658 = vsyncadd [#allocation6], 4294963200 }
  0x59   :  { %1659 = dma.done.wait [#allocation9], 2048  }
  0x5a   :  { %1660 = vsyncadd [#allocation9], 4294965248  ;;  %v1672_v0 = vmov 0   ;;  %v1459_v1 = vld [vmem:[#allocation5 + $0x4] ss:$8 sps:$4 sm:$0xff]   ;;  %v1495_v19 = vld [vmem:[#allocation7 + $0x50] sm:$0xff]   ;;  %v136_v44 = vlaneseq }
  0x5b   :  { %306 = vmatprep.mubr.bf16.mxu0 %v1672_v0  ;;  %v1461_v2 = vld [vmem:[#allocation5] ss:$8 sps:$4 sm:$0xff]   ;;  %274 = vmatprep.subr.bf16.mxu0 %v1459_v1  ;;  %v1462_v3 = vld [vmem:[#allocation5 + $0x14] ss:$8 sps:$4 sm:$0xff]   ;;  %v1464_v4 = vld [vmem:[#allocation5 + $0x10] ss:$8 sps:$4 sm:$0xff]  }
  0x5c   :  { %275 = vmatpush1.bf16.msra.mxu0 %v1461_v2  ;;  %v1465_v5 = vld [vmem:[#allocation5 + $0x24] ss:$8 sps:$4 sm:$0xff]   ;;  %v1467_v6 = vld [vmem:[#allocation5 + $0x20] ss:$8 sps:$4 sm:$0xff]   ;;  %v1468_v7 = vld [vmem:[#allocation5 + $0x34] ss:$8 sps:$4 sm:$0xff]  }
  0x5d   :  { %276 = vmatprep.subr.bf16.mxu0 %v1462_v3  ;;  %v1470_v8 = vld [vmem:[#allocation5 + $0x30] ss:$8 sps:$4 sm:$0xff]   ;;  %v1471_v9 = vld [vmem:[#allocation5 + $0x44] ss:$8 sps:$4 sm:$0xff]   ;;  %v1473_v10 = vld [vmem:[#allocation5 + $0x40] ss:$8 sps:$4 sm:$0xff]  }
  0x5e   :  { %v1474_v11 = vld [vmem:[#allocation5 + $0x54] ss:$8 sps:$4 sm:$0xff]   ;;  %v1476_v12 = vld [vmem:[#allocation5 + $0x50] ss:$8 sps:$4 sm:$0xff]   ;;  %v1477_v13 = vld [vmem:[#allocation5 + $0x64] ss:$8 sps:$4 sm:$0xff]  }
  0x5f   :  { %v1491_v14 = vld [vmem:[#allocation7 + $0x40] sm:$0xff]   ;;  %v1493_v17 = vld [vmem:[#allocation7 + $0x48] sm:$0xff]   ;;  %v1480_v20 = vld [vmem:[#allocation5 + $0x74] ss:$8 sps:$4 sm:$0xff]   ;;  %v137_v45 = vshrl.u32 %v136_v44, 7 }
  0x60   :  { %277 = vmatpush1.bf16.msra.mxu0 %v1464_v4  ;;  %v1492_v15 = vld [vmem:[#allocation7] sm:$0xff]   ;;  %1288 = vmatprep.subr.bf16.mxu1 %v1491_v14  ;;  %v1494_v18 = vld [vmem:[#allocation7 + $0x8] sm:$0xff]   ;;  %v1482_v21 = vld [vmem:[#allocation5 + $0x70] ss:$8 sps:$4 sm:$0xff]  }
  0x61   :  { %278 = vmatprep.subr.bf16.mxu0 %v1465_v5  ;;  %v1479_v16 = vld [vmem:[#allocation5 + $0x60] ss:$8 sps:$4 sm:$0xff]   ;;  %1289 = vmatpush3.bf16.msra.mxu1 %v1492_v15  ;;  %v1496_v22 = vld [vmem:[#allocation7 + $0x10] sm:$0xff]   ;;  %v1497_v23 = vld [vmem:[#allocation7 + $0x58] sm:$0xff]   ;;  %v138_v46 = vsub.s32 0, %v137_v45  ;;  %v142_v48 = vsub.s32 1, %v137_v45 }
  0x62   :  { %1290 = vmatprep.subr.bf16.mxu1 %v1493_v17  ;;  %v1483_v24 = vld [vmem:[#allocation2] sm:$0xff]   ;;  %v1498_v25 = vld [vmem:[#allocation7 + $0x18] sm:$0xff]   ;;  %v1501_v28 = vld [vmem:[#allocation7 + $0x68] sm:$0xff]  }
  0x63   :  { %v1499_v26 = vld [vmem:[#allocation7 + $0x60] sm:$0xff]   ;;  %v1484_v29 = vld [vmem:[#allocation2 + $0x8] sm:$0xff]   ;;  %v1485_v30 = vld [vmem:[#allocation2 + $0x10] sm:$0xff]  }
  0x64   :  { %279 = vmatpush1.bf16.msra.mxu0 %v1467_v6  ;;  %v1500_v27 = vld [vmem:[#allocation7 + $0x20] sm:$0xff]   ;;  %v1486_v31 = vld [vmem:[#allocation2 + $0x18] sm:$0xff]   ;;  %v1488_v33 = vld [vmem:[#allocation2 + $0x28] sm:$0xff]  }
  0x65   :  { %280 = vmatprep.subr.bf16.mxu0 %v1468_v7  ;;  %1291 = vmatpush3.bf16.msra.mxu1 %v1494_v18  ;;  %v1487_v32 = vld [vmem:[#allocation2 + $0x20] sm:$0xff]   ;;  %v1489_v34 = vld [vmem:[#allocation2 + $0x30] sm:$0xff]   ;;  %v1490_v35 = vld [vmem:[#allocation2 + $0x38] sm:$0xff]  }
  0x66   :  { %1292 = vmatprep.subr.bf16.mxu1 %v1495_v19  ;;  %v1502_v36 = vld [vmem:[#allocation7 + $0x28] sm:$0xff]   ;;  %v1503_v37 = vld [vmem:[#allocation7 + $0x70] sm:$0xff]   ;;  %v1505_v39 = vld [vmem:[#allocation7 + $0x78] sm:$0xff]  }
  0x67   :  { %v1504_v38 = vld [vmem:[#allocation7 + $0x30] sm:$0xff]   ;;  %v1506_v40 = vld [vmem:[#allocation7 + $0x38] sm:$0xff]   ;;  %v1507_v41 = vld [vmem:[#allocation8] sm:$0xff]  }
  0x68   :  { %281 = vmatpush1.bf16.msra.mxu0 %v1470_v8  ;;  %v1508_v42 = vld [vmem:[#allocation8 + $0x8] sm:$0xff]   ;;  %v1509_v43 = vld [vmem:[#allocation8 + $0x10] sm:$0xff]   ;;  %v134_v47 = vld [vmem:[%s1887_s2] sm:$0x3] }
  0x69   :  { %282 = vmatprep.subr.bf16.mxu0 %v1471_v9  ;;  %1293 = vmatpush3.bf16.msra.mxu1 %v1496_v22  ;;  %v1807_v49 = vrot.slane %v134_v47, %v138_v46  ;;  %v1809_v50 = vrot.slane %v134_v47, %v142_v48 }
  0x6a   :  { %1294 = vmatprep.subr.bf16.mxu1 %v1497_v23 }
  0x6c   :  { %283 = vmatpush1.bf16.msra.mxu0 %v1473_v10 }
  0x6d   :  { %284 = vmatprep.subr.bf16.mxu0 %v1474_v11  ;;  %1295 = vmatpush3.bf16.msra.mxu1 %v1498_v25 }
  0x6e   :  { %1296 = vmatprep.subr.bf16.mxu1 %v1499_v26 }
  0x70   :  { %285 = vmatpush1.bf16.msra.mxu0 %v1476_v12 }
  0x71   :  { %286 = vmatprep.subr.bf16.mxu0 %v1477_v13  ;;  %1297 = vmatpush3.bf16.msra.mxu1 %v1500_v27 }
  0x72   :  { %1298 = vmatprep.subr.bf16.mxu1 %v1501_v28 }
  0x74   :  { %287 = vmatpush1.bf16.msra.mxu0 %v1479_v16 }
  0x75   :  { %288 = vmatprep.subr.bf16.mxu0 %v1480_v20  ;;  %1299 = vmatpush3.bf16.msra.mxu1 %v1502_v36 }
  0x76   :  { %1300 = vmatprep.subr.bf16.mxu1 %v1503_v37 }
  0x78   :  { %289 = vmatpush1.bf16.msra.mxu0 %v1482_v21 }
  0x79   :  { %1301 = vmatpush3.bf16.msra.mxu1 %v1504_v38  ;;  %1384 = vmatprep.subr.bf16.mxu0 %v1507_v41 }
  0x7a   :  { %1302 = vmatprep.subr.bf16.mxu1 %v1505_v39 }
  0x7b   :  { %307 = vmatmul.mubr.bf16.vlgmr.msra.gmra.mrb[0].mxu0 %v1483_v24 }
  0x7c   :  { %316 = vmatprep.mubr.bf16.mxu0 %v1672_v0  ;;  %1385 = vmatpush3.bf16.msra.mxu0 %v1507_v41 }
  0x7d   :  { %1303 = vmatpush3.bf16.msra.mxu1 %v1506_v40  ;;  %1386 = vmatprep.subr.bf16.mxu0 %v1508_v42 }
  0x80   :  { %1387 = vmatpush3.bf16.msra.mxu0 %v1508_v42 }
  0x81   :  { %1388 = vmatprep.subr.bf16.mxu0 %v1509_v43 }
  0x83   :  { %317 = vmatmul.mubr.bf16.gmra.mrb[4].mxu0 %v1484_v29 }
  0x84   :  { %326 = vmatprep.mubr.bf16.mxu0 %v1672_v0  ;;  %1389 = vmatpush3.bf16.msra.mxu0 %v1509_v43 }
  0x8b   :  { %327 = vmatmul.mubr.bf16.gmra.mrb[8].mxu0 %v1485_v30 }
  0x8c   :  { %336 = vmatprep.mubr.bf16.mxu0 %v1672_v0 }
  0x93   :  { %337 = vmatmul.mubr.bf16.gmra.mrb[12].mxu0 %v1486_v31 }
  0x94   :  { %346 = vmatprep.mubr.bf16.mxu0 %v1672_v0 }
  0x9b   :  { %347 = vmatmul.mubr.bf16.gmra.mrb[16].mxu0 %v1487_v32 }
  0x9c   :  { %356 = vmatprep.mubr.bf16.mxu0 %v1672_v0 }
  0xa3   :  { %357 = vmatmul.mubr.bf16.gmra.mrb[20].mxu0 %v1488_v33 }
  0xa4   :  { %366 = vmatprep.mubr.bf16.mxu0 %v1672_v0 }
  0xab   :  { %367 = vmatmul.mubr.bf16.gmra.mrb[24].mxu0 %v1489_v34 }
  0xac   :  { %376 = vmatprep.mubr.bf16.mxu0 %v1672_v0 }
  0xb3   :  { %377 = vmatmul.mubr.bf16.gmra.mrb[28].mxu0 %v1490_v35 }
 0x14e   :  { %v308_v51 = vpop.f32.mrb[0].mxu0 }
 0x14f   :  { %v309_v52 = vadd.f32 %v308_v51, %v1807_v49  ;;  %v310_v53 = vpop.f32.mrb[1].mxu0 }
 0x150   :  { %v311_v54 = vadd.f32 %v310_v53, %v1809_v50  ;;  %v312_v55 = vpop.f32.mrb[2].mxu0 }
 0x151   :  { %v313_v56 = vadd.f32 %v312_v55, %v1807_v49  ;;  %v314_v57 = vpop.f32.mrb[3].mxu0  ;;  %v387_v59 = vmax.f32 %v309_v52, 0.0 }
 0x152   :  { %v315_v58 = vadd.f32 %v314_v57, %v1809_v50  ;;  %v388_v61 = vmax.f32 %v311_v54, 0.0 }
 0x153   :  { %v389_v60 = vmax.f32 %v313_v56, 0.0 }
 0x154   :  { %v390_v62 = vmax.f32 %v315_v58, 0.0 }
 0x155   :  { %v419_v63 = vpack.c.bf16 %v389_v60, %v387_v59 }
 0x156   :  { %v318_v0 = vpop.f32.mrb[4].mxu0  ;;  %v420_v1 = vpack.c.bf16 %v390_v62, %v388_v61 }
 0x157   :  { %v319_v2 = vadd.f32 %v318_v0, %v1807_v49  ;;  %v320_v3 = vpop.f32.mrb[5].mxu0 }
 0x158   :  { %v321_v4 = vadd.f32 %v320_v3, %v1809_v50  ;;  %v322_v5 = vpop.f32.mrb[6].mxu0  ;;  %602 = vmatprep.mubr.bf16.mxu1 %v420_v1 }
 0x159   :  { %v323_v6 = vadd.f32 %v322_v5, %v1807_v49  ;;  %v324_v7 = vpop.f32.mrb[7].mxu0  ;;  %603 = vmatmul.mubr.bf16.vlgmr.msra.gmra.mrb[0].mxu1 %v419_v63  ;;  %v391_v9 = vmax.f32 %v319_v2, 0.0 }
 0x15a   :  { %v325_v8 = vadd.f32 %v324_v7, %v1809_v50  ;;  %v392_v11 = vmax.f32 %v321_v4, 0.0 }
 0x15b   :  { %v393_v10 = vmax.f32 %v323_v6, 0.0 }
 0x15c   :  { %v394_v12 = vmax.f32 %v325_v8, 0.0 }
 0x15d   :  { %v421_v13 = vpack.c.bf16 %v393_v10, %v391_v9 }
 0x15e   :  { %v422_v14 = vpack.c.bf16 %v394_v12, %v392_v11  ;;  %v328_v15 = vpop.f32.mrb[8].mxu0 }
 0x15f   :  { %v329_v16 = vadd.f32 %v328_v15, %v1807_v49  ;;  %v330_v17 = vpop.f32.mrb[9].mxu0 }
 0x160   :  { %v331_v18 = vadd.f32 %v330_v17, %v1809_v50  ;;  %v332_v19 = vpop.f32.mrb[10].mxu0  ;;  %610 = vmatprep.mubr.bf16.mxu1 %v422_v14 }
 0x161   :  { %v333_v20 = vadd.f32 %v332_v19, %v1807_v49  ;;  %v334_v21 = vpop.f32.mrb[11].mxu0  ;;  %611 = vmatmul.mubr.bf16.gmra.mrb[4].mxu1 %v421_v13  ;;  %v395_v23 = vmax.f32 %v329_v16, 0.0 }
 0x162   :  { %v335_v22 = vadd.f32 %v334_v21, %v1809_v50  ;;  %v396_v25 = vmax.f32 %v331_v18, 0.0 }
 0x163   :  { %v397_v24 = vmax.f32 %v333_v20, 0.0 }
 0x164   :  { %v398_v26 = vmax.f32 %v335_v22, 0.0 }
 0x165   :  { %v423_v27 = vpack.c.bf16 %v397_v24, %v395_v23 }
 0x166   :  { %v424_v28 = vpack.c.bf16 %v398_v26, %v396_v25  ;;  %v338_v29 = vpop.f32.mrb[12].mxu0 }
 0x167   :  { %v339_v30 = vadd.f32 %v338_v29, %v1807_v49  ;;  %v340_v31 = vpop.f32.mrb[13].mxu0 }
 0x168   :  { %v341_v32 = vadd.f32 %v340_v31, %v1809_v50  ;;  %v342_v33 = vpop.f32.mrb[14].mxu0  ;;  %618 = vmatprep.mubr.bf16.mxu1 %v424_v28 }
 0x169   :  { %v343_v34 = vadd.f32 %v342_v33, %v1807_v49  ;;  %v344_v35 = vpop.f32.mrb[15].mxu0  ;;  %619 = vmatmul.mubr.bf16.gmra.mrb[8].mxu1 %v423_v27  ;;  %v399_v37 = vmax.f32 %v339_v30, 0.0 }
 0x16a   :  { %v345_v36 = vadd.f32 %v344_v35, %v1809_v50  ;;  %v400_v39 = vmax.f32 %v341_v32, 0.0 }
 0x16b   :  { %v401_v38 = vmax.f32 %v343_v34, 0.0 }
 0x16c   :  { %v402_v40 = vmax.f32 %v345_v36, 0.0 }
 0x16d   :  { %v425_v41 = vpack.c.bf16 %v401_v38, %v399_v37  ;;  %v1510_v37 = vld [vmem:[#allocation8 + $0x18] sm:$0xff]   ;;  %v1511_v38 = vld [vmem:[#allocation8 + $0x20] sm:$0xff]  }
 0x16e   :  { %v426_v42 = vpack.c.bf16 %v402_v40, %v400_v39  ;;  %v348_v43 = vpop.f32.mrb[16].mxu0  ;;  %1390 = vmatprep.subr.bf16.mxu0 %v1510_v37  ;;  %v1512_v39 = vld [vmem:[#allocation8 + $0x28] sm:$0xff]   ;;  %v1515_v40 = vld [vmem:[#allocation10] sm:$0xff]  }
 0x16f   :  { %v349_v44 = vadd.f32 %v348_v43, %v1807_v49  ;;  %v350_v45 = vpop.f32.mrb[17].mxu0  ;;  %1391 = vmatpush3.bf16.msra.mxu0 %v1510_v37  ;;  %1416 = vmatprep.subr.bf16.mxu1 %v1515_v40  ;;  %v1518_v43 = vld [vmem:[#allocation10 + $0x18] sm:$0xff]  }
 0x170   :  { %v351_v46 = vadd.f32 %v350_v45, %v1809_v50  ;;  %v352_v47 = vpop.f32.mrb[18].mxu0  ;;  %626 = vmatprep.mubr.bf16.mxu1 %v426_v42  ;;  %1392 = vmatprep.subr.bf16.mxu0 %v1511_v38  ;;  %v1517_v42 = vld [vmem:[#allocation10 + $0x10] sm:$0xff]   ;;  %v1520_v45 = vld [vmem:[#allocation10 + $0x28] sm:$0xff]  }
 0x171   :  { %v353_v48 = vadd.f32 %v352_v47, %v1807_v49  ;;  %v354_v51 = vpop.f32.mrb[19].mxu0  ;;  %627 = vmatmul.mubr.bf16.gmra.mrb[12].mxu1 %v425_v41  ;;  %v403_v53 = vmax.f32 %v349_v44, 0.0  ;;  %v1516_v41 = vld [vmem:[#allocation10 + $0x8] sm:$0xff]   ;;  %v1519_v44 = vld [vmem:[#allocation10 + $0x20] sm:$0xff]  }
 0x172   :  { %v355_v52 = vadd.f32 %v354_v51, %v1809_v50  ;;  %v404_v55 = vmax.f32 %v351_v46, 0.0  ;;  %1417 = vmatpush3.bf16.msra.mxu1 %v1515_v40  ;;  %v1846_v47 = vld [vmem:[%s1889_s4] ss:$0 sm:$0xff] }
 0x173   :  { %v405_v54 = vmax.f32 %v353_v48, 0.0  ;;  %1393 = vmatpush3.bf16.msra.mxu0 %v1511_v38  ;;  %1418 = vmatprep.subr.bf16.mxu1 %v1516_v41 }
 0x174   :  { %v406_v56 = vmax.f32 %v355_v52, 0.0  ;;  %1394 = vmatprep.subr.bf16.mxu0 %v1512_v39 }
 0x175   :  { %v427_v57 = vpack.c.bf16 %v405_v54, %v403_v53 }
 0x176   :  { %v428_v58 = vpack.c.bf16 %v406_v56, %v404_v55  ;;  %v358_v59 = vpop.f32.mrb[20].mxu0  ;;  %1419 = vmatpush3.bf16.msra.mxu1 %v1516_v41 }
 0x177   :  { %v359_v60 = vadd.f32 %v358_v59, %v1807_v49  ;;  %v360_v61 = vpop.f32.mrb[21].mxu0  ;;  %1395 = vmatpush3.bf16.msra.mxu0 %v1512_v39  ;;  %1420 = vmatprep.subr.bf16.mxu1 %v1517_v42 }
 0x178   :  { %v361_v62 = vadd.f32 %v360_v61, %v1809_v50  ;;  %v362_v63 = vpop.f32.mrb[22].mxu0  ;;  %634 = vmatprep.mubr.bf16.mxu1 %v428_v58 }
 0x179   :  { %v363_v0 = vadd.f32 %v362_v63, %v1807_v49  ;;  %v364_v1 = vpop.f32.mrb[23].mxu0  ;;  %635 = vmatmul.mubr.bf16.gmra.mrb[16].mxu1 %v427_v57  ;;  %v407_v3 = vmax.f32 %v359_v60, 0.0 }
 0x17a   :  { %v365_v2 = vadd.f32 %v364_v1, %v1809_v50  ;;  %v408_v5 = vmax.f32 %v361_v62, 0.0  ;;  %1421 = vmatpush3.bf16.msra.mxu1 %v1517_v42 }
 0x17b   :  { %v409_v4 = vmax.f32 %v363_v0, 0.0  ;;  %1422 = vmatprep.subr.bf16.mxu1 %v1518_v43 }
 0x17c   :  { %v410_v6 = vmax.f32 %v365_v2, 0.0 }
 0x17d   :  { %v429_v7 = vpack.c.bf16 %v409_v4, %v407_v3 }
 0x17e   :  { %v430_v8 = vpack.c.bf16 %v410_v6, %v408_v5  ;;  %v368_v9 = vpop.f32.mrb[24].mxu0  ;;  %1423 = vmatpush3.bf16.msra.mxu1 %v1518_v43 }
 0x17f   :  { %v369_v10 = vadd.f32 %v368_v9, %v1807_v49  ;;  %v370_v11 = vpop.f32.mrb[25].mxu0  ;;  %1424 = vmatprep.subr.bf16.mxu1 %v1519_v44 }
 0x180   :  { %v371_v12 = vadd.f32 %v370_v11, %v1809_v50  ;;  %v372_v13 = vpop.f32.mrb[26].mxu0  ;;  %642 = vmatprep.mubr.bf16.mxu1 %v430_v8 }
 0x181   :  { %v373_v14 = vadd.f32 %v372_v13, %v1807_v49  ;;  %v374_v15 = vpop.f32.mrb[27].mxu0  ;;  %643 = vmatmul.mubr.bf16.gmra.mrb[20].mxu1 %v429_v7  ;;  %v411_v17 = vmax.f32 %v369_v10, 0.0 }
 0x182   :  { %v375_v16 = vadd.f32 %v374_v15, %v1809_v50  ;;  %v412_v19 = vmax.f32 %v371_v12, 0.0  ;;  %1425 = vmatpush3.bf16.msra.mxu1 %v1519_v44 }
 0x183   :  { %v413_v18 = vmax.f32 %v373_v14, 0.0  ;;  %1426 = vmatprep.subr.bf16.mxu1 %v1520_v45 }
 0x184   :  { %v414_v20 = vmax.f32 %v375_v16, 0.0 }
 0x185   :  { %v431_v21 = vpack.c.bf16 %v413_v18, %v411_v17 }
 0x186   :  { %v432_v22 = vpack.c.bf16 %v414_v20, %v412_v19  ;;  %v378_v23 = vpop.f32.mrb[28].mxu0  ;;  %1427 = vmatpush3.bf16.msra.mxu1 %v1520_v45 }
 0x187   :  { %v379_v24 = vadd.f32 %v378_v23, %v1807_v49  ;;  %v380_v25 = vpop.f32.mrb[29].mxu0 }
 0x188   :  { %v381_v26 = vadd.f32 %v380_v25, %v1809_v50  ;;  %v382_v27 = vpop.f32.mrb[30].mxu0  ;;  %650 = vmatprep.mubr.bf16.mxu1 %v432_v22 }
 0x189   :  { %v383_v28 = vadd.f32 %v382_v27, %v1807_v49  ;;  %v384_v29 = vpop.f32.mrb[31].mxu0  ;;  %651 = vmatmul.mubr.bf16.gmra.mrb[24].mxu1 %v431_v21  ;;  %v415_v31 = vmax.f32 %v379_v24, 0.0  ;;  %v1513_v49 = vld [vmem:[#allocation8 + $0x30] sm:$0xff]  }
 0x18a   :  { %v385_v30 = vadd.f32 %v384_v29, %v1809_v50  ;;  %v416_v33 = vmax.f32 %v381_v26, 0.0  ;;  %1396 = vmatprep.subr.bf16.mxu0 %v1513_v49  ;;  %v1514_v50 = vld [vmem:[#allocation8 + $0x38] sm:$0xff]  }
 0x18b   :  { %v417_v32 = vmax.f32 %v383_v28, 0.0  ;;  %1397 = vmatpush3.bf16.msra.mxu0 %v1513_v49 }
 0x18c   :  { %v418_v34 = vmax.f32 %v385_v30, 0.0  ;;  %1398 = vmatprep.subr.bf16.mxu0 %v1514_v50 }
 0x18d   :  { %v433_v35 = vpack.c.bf16 %v417_v32, %v415_v31 }
 0x18e   :  { %v434_v36 = vpack.c.bf16 %v418_v34, %v416_v33 }
 0x18f   :  { %1399 = vmatpush3.bf16.msra.mxu0 %v1514_v50 }
 0x190   :  { %658 = vmatprep.mubr.bf16.mxu1 %v434_v36 }
 0x191   :  { %659 = vmatmul.mubr.bf16.gmra.mrb[28].mxu1 %v433_v35 }
 0x22c   :  { %v1304_v46 = vpop.f32.mrb[0].mxu1 }
 0x22d   :  { %v1305_v48 = vpop.f32.mrb[1].mxu1 }
 0x22e   :  { %v1306_v51 = vadd.f32 %v1305_v48, %v1304_v46  ;;  %v1307_v52 = vpop.f32.mrb[2].mxu1 }
 0x22f   :  { %v1308_v53 = vpop.f32.mrb[3].mxu1 }
 0x230   :  { %v605_v54 = vadd.f32 %v1306_v51, %v1846_v47  ;;  %v1309_v55 = vadd.f32 %v1308_v53, %v1307_v52 }
 0x232   :  { %v608_v56 = vadd.f32 %v1309_v55, %v1846_v47  ;;  %v667_v57 = vmax.f32 %v605_v54, 0.0 }
 0x234   :  { %v668_v58 = vmax.f32 %v608_v56, 0.0  ;;  %v1310_v59 = vpop.f32.mrb[4].mxu1 }
 0x235   :  { %v1311_v60 = vpop.f32.mrb[5].mxu1 }
 0x236   :  { %v1312_v61 = vadd.f32 %v1311_v60, %v1310_v59  ;;  %v1313_v62 = vpop.f32.mrb[6].mxu1  ;;  %v683_v63 = vpack.c.bf16 %v668_v58, %v667_v57 }
 0x237   :  { %v1314_v0 = vpop.f32.mrb[7].mxu1 }
 0x238   :  { %v613_v1 = vadd.f32 %v1312_v61, %v1846_v47  ;;  %v1315_v2 = vadd.f32 %v1314_v0, %v1313_v62  ;;  %1400 = vmatprep.mubr.bf16.mxu0 %v683_v63 }
 0x23a   :  { %v616_v3 = vadd.f32 %v1315_v2, %v1846_v47  ;;  %v669_v4 = vmax.f32 %v613_v1, 0.0 }
 0x23c   :  { %v670_v5 = vmax.f32 %v616_v3, 0.0  ;;  %v1316_v6 = vpop.f32.mrb[8].mxu1 }
 0x23d   :  { %v1317_v7 = vpop.f32.mrb[9].mxu1 }
 0x23e   :  { %v684_v8 = vpack.c.bf16 %v670_v5, %v669_v4  ;;  %v1318_v9 = vadd.f32 %v1317_v7, %v1316_v6  ;;  %v1319_v10 = vpop.f32.mrb[10].mxu1 }
 0x23f   :  { %v1320_v11 = vpop.f32.mrb[11].mxu1 }
 0x240   :  { %v621_v12 = vadd.f32 %v1318_v9, %v1846_v47  ;;  %v1321_v13 = vadd.f32 %v1320_v11, %v1319_v10  ;;  %1401 = vmatmul.mubr.bf16.vlgmr.msra.gmra.mrb[32].mxu0 %v684_v8  ;;  %v1521_v10 = vld [vmem:[#allocation10 + $0x30] sm:$0xff]   ;;  %v1522_v11 = vld [vmem:[#allocation10 + $0x38] sm:$0xff]  }
 0x241   :  { %1428 = vmatprep.subr.bf16.mxu1 %v1521_v10 }
 0x242   :  { %v624_v14 = vadd.f32 %v1321_v13, %v1846_v47  ;;  %v671_v15 = vmax.f32 %v621_v12, 0.0  ;;  %1429 = vmatpush3.bf16.msra.mxu1 %v1521_v10  ;;  %v1191_v12 = vld [vmem:[%s1891_s6] ss:$0 sm:$0xff] }
 0x243   :  { %1430 = vmatprep.subr.bf16.mxu1 %v1522_v11 }
 0x244   :  { %v672_v16 = vmax.f32 %v624_v14, 0.0  ;;  %v1322_v17 = vpop.f32.mrb[12].mxu1 }
 0x245   :  { %v1323_v18 = vpop.f32.mrb[13].mxu1 }
 0x246   :  { %v1324_v19 = vadd.f32 %v1323_v18, %v1322_v17  ;;  %v1325_v20 = vpop.f32.mrb[14].mxu1  ;;  %v685_v21 = vpack.c.bf16 %v672_v16, %v671_v15  ;;  %1431 = vmatpush3.bf16.msra.mxu1 %v1522_v11 }
 0x247   :  { %v1326_v22 = vpop.f32.mrb[15].mxu1 }
 0x248   :  { %v629_v23 = vadd.f32 %v1324_v19, %v1846_v47  ;;  %v1327_v24 = vadd.f32 %v1326_v22, %v1325_v20  ;;  %1404 = vmatprep.mubr.bf16.mxu0 %v685_v21 }
 0x24a   :  { %v632_v25 = vadd.f32 %v1327_v24, %v1846_v47  ;;  %v673_v26 = vmax.f32 %v629_v23, 0.0 }
 0x24c   :  { %v674_v27 = vmax.f32 %v632_v25, 0.0  ;;  %v1328_v28 = vpop.f32.mrb[16].mxu1 }
 0x24d   :  { %v1329_v29 = vpop.f32.mrb[17].mxu1 }
 0x24e   :  { %v1330_v30 = vadd.f32 %v1329_v29, %v1328_v28  ;;  %v1331_v31 = vpop.f32.mrb[18].mxu1  ;;  %v686_v32 = vpack.c.bf16 %v674_v27, %v673_v26 }
 0x24f   :  { %v1332_v33 = vpop.f32.mrb[19].mxu1 }
 0x250   :  { %v637_v34 = vadd.f32 %v1330_v30, %v1846_v47  ;;  %v1333_v35 = vadd.f32 %v1332_v33, %v1331_v31  ;;  %1405 = vmatmul.mubr.bf16.gmra.mrb[36].mxu0 %v686_v32 }
 0x252   :  { %v640_v36 = vadd.f32 %v1333_v35, %v1846_v47  ;;  %v675_v37 = vmax.f32 %v637_v34, 0.0 }
 0x254   :  { %v676_v38 = vmax.f32 %v640_v36, 0.0  ;;  %v1334_v39 = vpop.f32.mrb[20].mxu1 }
 0x255   :  { %v1335_v49 = vpop.f32.mrb[21].mxu1 }
 0x256   :  { %v1336_v50 = vadd.f32 %v1335_v49, %v1334_v39  ;;  %v1337_v40 = vpop.f32.mrb[22].mxu1  ;;  %v687_v41 = vpack.c.bf16 %v676_v38, %v675_v37 }
 0x257   :  { %v1338_v42 = vpop.f32.mrb[23].mxu1 }
 0x258   :  { %v645_v43 = vadd.f32 %v1336_v50, %v1846_v47  ;;  %v1339_v44 = vadd.f32 %v1338_v42, %v1337_v40  ;;  %1408 = vmatprep.mubr.bf16.mxu0 %v687_v41 }
 0x25a   :  { %v648_v45 = vadd.f32 %v1339_v44, %v1846_v47  ;;  %v677_v46 = vmax.f32 %v645_v43, 0.0 }
 0x25c   :  { %v678_v48 = vmax.f32 %v648_v45, 0.0  ;;  %v1340_v51 = vpop.f32.mrb[24].mxu1 }
 0x25d   :  { %v1341_v52 = vpop.f32.mrb[25].mxu1 }
 0x25e   :  { %v1342_v53 = vadd.f32 %v1341_v52, %v1340_v51  ;;  %v1343_v54 = vpop.f32.mrb[26].mxu1  ;;  %v688_v55 = vpack.c.bf16 %v678_v48, %v677_v46 }
 0x25f   :  { %v1344_v56 = vpop.f32.mrb[27].mxu1 }
 0x260   :  { %v653_v57 = vadd.f32 %v1342_v53, %v1846_v47  ;;  %v1345_v58 = vadd.f32 %v1344_v56, %v1343_v54  ;;  %1409 = vmatmul.mubr.bf16.gmra.mrb[40].mxu0 %v688_v55 }
 0x262   :  { %v656_v59 = vadd.f32 %v1345_v58, %v1846_v47  ;;  %v679_v60 = vmax.f32 %v653_v57, 0.0 }
 0x264   :  { %v680_v61 = vmax.f32 %v656_v59, 0.0  ;;  %v1346_v62 = vpop.f32.mrb[28].mxu1 }
 0x265   :  { %v1347_v63 = vpop.f32.mrb[29].mxu1 }
 0x266   :  { %v1348_v0 = vadd.f32 %v1347_v63, %v1346_v62  ;;  %v1349_v1 = vpop.f32.mrb[30].mxu1  ;;  %v689_v2 = vpack.c.bf16 %v680_v61, %v679_v60 }
 0x267   :  { %v1350_v3 = vpop.f32.mrb[31].mxu1 }
 0x268   :  { %v661_v4 = vadd.f32 %v1348_v0, %v1846_v47  ;;  %v1351_v5 = vadd.f32 %v1350_v3, %v1349_v1  ;;  %1412 = vmatprep.mubr.bf16.mxu0 %v689_v2 }
 0x26a   :  { %v664_v6 = vadd.f32 %v1351_v5, %v1846_v47  ;;  %v681_v7 = vmax.f32 %v661_v4, 0.0 }
 0x26c   :  { %v682_v8 = vmax.f32 %v664_v6, 0.0  ;;  %v1200_v6 = vld [vmem:[%s1893_s8] ss:$0 sm:$0xff]  ;;  %s1673_s8 = smov [#allocation11]  }
 0x26d   :  { %s1136_s12 = sshll.u32 %s1673_s8, 4  ;;  %s1137_s12 = int_to_ptr.vmem [resolvable:$true] %s1136_s12 }
 0x26e   :  { %v690_v9 = vpack.c.bf16 %v682_v8, %v681_v7  ;;  %s1633_s13 = scalar_lea.vmem %s1137_s12, 1024  ;;  %p1638_p13 = scmp.lt.s32.totalorder %s1137_s12, %s1137_s12 }
 0x26f   :  { %p1634_p12 = scmp.ne.s32.totalorder %s1137_s12, %s1633_s13  ;;  %p1639_p0 = scmp.lt.s32.totalorder %s1633_s13, %s1633_s13 }
 0x270   :  { %1413 = vmatmul.mubr.bf16.gmra.mrb[44].mxu0 %v690_v9 }
 0x271   :  { %p1640_p1 = por %p1639_p0, %p1638_p13 }
 0x273   :  { %p1641_p2 = pnand %p1640_p1, %p1634_p12 }
 0x313   :  { %v1402_v13 = vpop.f32.mrb[32].mxu0 }
 0x314   :  { %v805_v14 = vadd.f32 %v1402_v13, %v1191_v12  ;;  %v796_v15 = vpop.f32.mrb[33].mxu0 }
 0x315   :  { %v797_v16 = vadd.f32 %v1191_v12, %v796_v15  ;;  %v1403_v17 = vpop.f32.mrb[34].mxu0 }
 0x316   :  { %v808_v47 = vadd.f32 %v1403_v17, %v1191_v12  ;;  %v799_v18 = vpop.f32.mrb[35].mxu0  ;;  %v861_v20 = vmax.f32 %v805_v14, 0.0 }
 0x317   :  { %v800_v19 = vadd.f32 %v1191_v12, %v799_v18  ;;  %v859_v22 = vmax.f32 %v797_v16, 0.0 }
 0x318   :  { %v862_v21 = vmax.f32 %v808_v47, 0.0 }
 0x319   :  { %v860_v23 = vmax.f32 %v800_v19, 0.0 }
 0x31a   :  { %v876_v24 = vpack.c.bf16 %v862_v21, %v861_v20 }
 0x31b   :  { %v875_v25 = vpack.c.bf16 %v860_v23, %v859_v22 }
 0x31d   :  { %1432 = vmatprep.mubr.bf16.mxu1 %v875_v25 }
 0x31e   :  { %1433 = vmatmul.mubr.bf16.vlgmr.msra.gmra.mrb[32].mxu1 %v876_v24 }
 0x323   :  { %v1406_v26 = vpop.f32.mrb[36].mxu0 }
 0x324   :  { %v821_v27 = vadd.f32 %v1406_v26, %v1191_v12  ;;  %v812_v28 = vpop.f32.mrb[37].mxu0 }
 0x325   :  { %v813_v29 = vadd.f32 %v1191_v12, %v812_v28  ;;  %v1407_v30 = vpop.f32.mrb[38].mxu0 }
 0x326   :  { %v824_v31 = vadd.f32 %v1407_v30, %v1191_v12  ;;  %v815_v32 = vpop.f32.mrb[39].mxu0  ;;  %v865_v34 = vmax.f32 %v821_v27, 0.0 }
 0x327   :  { %v816_v33 = vadd.f32 %v1191_v12, %v815_v32  ;;  %v863_v36 = vmax.f32 %v813_v29, 0.0 }
 0x328   :  { %v866_v35 = vmax.f32 %v824_v31, 0.0 }
 0x329   :  { %v864_v37 = vmax.f32 %v816_v33, 0.0 }
 0x32a   :  { %v878_v38 = vpack.c.bf16 %v866_v35, %v865_v34 }
 0x32b   :  { %v877_v39 = vpack.c.bf16 %v864_v37, %v863_v36 }
 0x32d   :  { %1436 = vmatprep.mubr.bf16.mxu1 %v877_v39 }
 0x32e   :  { %1437 = vmatmul.mubr.bf16.gmra.mrb[36].mxu1 %v878_v38 }
 0x333   :  { %v1410_v49 = vpop.f32.mrb[40].mxu0 }
 0x334   :  { %v837_v50 = vadd.f32 %v1410_v49, %v1191_v12  ;;  %v828_v40 = vpop.f32.mrb[41].mxu0 }
 0x335   :  { %v829_v41 = vadd.f32 %v1191_v12, %v828_v40  ;;  %v1411_v42 = vpop.f32.mrb[42].mxu0 }
 0x336   :  { %v840_v43 = vadd.f32 %v1411_v42, %v1191_v12  ;;  %v831_v44 = vpop.f32.mrb[43].mxu0  ;;  %v869_v46 = vmax.f32 %v837_v50, 0.0 }
 0x337   :  { %v832_v45 = vadd.f32 %v1191_v12, %v831_v44  ;;  %v867_v51 = vmax.f32 %v829_v41, 0.0 }
 0x338   :  { %v870_v48 = vmax.f32 %v840_v43, 0.0 }
 0x339   :  { %v868_v52 = vmax.f32 %v832_v45, 0.0 }
 0x33a   :  { %v880_v53 = vpack.c.bf16 %v870_v48, %v869_v46 }
 0x33b   :  { %v879_v54 = vpack.c.bf16 %v868_v52, %v867_v51 }
 0x33d   :  { %1440 = vmatprep.mubr.bf16.mxu1 %v879_v54 }
 0x33e   :  { %1441 = vmatmul.mubr.bf16.gmra.mrb[40].mxu1 %v880_v53 }
 0x343   :  { %v1414_v55 = vpop.f32.mrb[44].mxu0 }
 0x344   :  { %v853_v56 = vadd.f32 %v1414_v55, %v1191_v12  ;;  %v844_v57 = vpop.f32.mrb[45].mxu0 }
 0x345   :  { %v845_v58 = vadd.f32 %v1191_v12, %v844_v57  ;;  %v1415_v59 = vpop.f32.mrb[46].mxu0 }
 0x346   :  { %v856_v60 = vadd.f32 %v1415_v59, %v1191_v12  ;;  %v847_v61 = vpop.f32.mrb[47].mxu0  ;;  %v873_v63 = vmax.f32 %v853_v56, 0.0 }
 0x347   :  { %v848_v62 = vadd.f32 %v1191_v12, %v847_v61  ;;  %v871_v1 = vmax.f32 %v845_v58, 0.0 }
 0x348   :  { %v874_v0 = vmax.f32 %v856_v60, 0.0 }
 0x349   :  { %v872_v2 = vmax.f32 %v848_v62, 0.0 }
 0x34a   :  { %v882_v3 = vpack.c.bf16 %v874_v0, %v873_v63 }
 0x34b   :  { %v881_v4 = vpack.c.bf16 %v872_v2, %v871_v1 }
 0x34d   :  { %1444 = vmatprep.mubr.bf16.mxu1 %v881_v4 }
 0x34e   :  { %1445 = vmatmul.mubr.bf16.gmra.mrb[44].mxu1 %v882_v3 }
 0x3f1   :  { %v1434_v5 = vpop.f32.mrb[32].mxu1 }
 0x3f2   :  { %v988_v7 = vpop.f32.mrb[33].mxu1  ;;  %v997_v9 = vadd.f32 %v1434_v5, %v1200_v6 }
 0x3f3   :  { %v1435_v8 = vpop.f32.mrb[34].mxu1  ;;  %v989_v13 = vadd.f32 %v1200_v6, %v988_v7 }
 0x3f4   :  { %v1000_v10 = vadd.f32 %v1435_v8, %v1200_v6  ;;  %v991_v11 = vpop.f32.mrb[35].mxu1 }
 0x3f5   :  { %v992_v12 = vadd.f32 %v1200_v6, %v991_v11 }
 0x3f6   :  { %v1249_v14 = vpack.c.bf16 %v1000_v10, %v997_v9 }
 0x3f7   :  { %v1244_v15 = vpack.c.bf16 %v992_v12, %v989_v13 }
 0x3f8   :  { %1281 = vst [vmem:[#allocation11 + $0x8] sm:$0xff] %v1249_v14  }
 0x3f9   :  { %1245 = vst [vmem:[#allocation11] sm:$0xff] %v1244_v15  }
 0x401   :  { %v1438_v16 = vpop.f32.mrb[36].mxu1 }
 0x402   :  { %v1004_v17 = vpop.f32.mrb[37].mxu1  ;;  %v1013_v18 = vadd.f32 %v1438_v16, %v1200_v6 }
 0x403   :  { %v1439_v47 = vpop.f32.mrb[38].mxu1  ;;  %v1005_v21 = vadd.f32 %v1200_v6, %v1004_v17 }
 0x404   :  { %v1016_v19 = vadd.f32 %v1439_v47, %v1200_v6  ;;  %v1007_v20 = vpop.f32.mrb[39].mxu1 }
 0x405   :  { %v1008_v22 = vadd.f32 %v1200_v6, %v1007_v20 }
 0x406   :  { %v1259_v23 = vpack.c.bf16 %v1016_v19, %v1013_v18 }
 0x407   :  { %v1254_v24 = vpack.c.bf16 %v1008_v22, %v1005_v21 }
 0x408   :  { %1283 = vst [vmem:[#allocation11 + $0x18] sm:$0xff] %v1259_v23  }
 0x409   :  { %1282 = vst [vmem:[#allocation11 + $0x10] sm:$0xff] %v1254_v24  }
 0x411   :  { %v1442_v25 = vpop.f32.mrb[40].mxu1 }
 0x412   :  { %v1020_v26 = vpop.f32.mrb[41].mxu1  ;;  %v1029_v28 = vadd.f32 %v1442_v25, %v1200_v6 }
 0x413   :  { %v1443_v27 = vpop.f32.mrb[42].mxu1  ;;  %v1021_v31 = vadd.f32 %v1200_v6, %v1020_v26 }
 0x414   :  { %v1032_v29 = vadd.f32 %v1443_v27, %v1200_v6  ;;  %v1023_v30 = vpop.f32.mrb[43].mxu1 }
 0x415   :  { %v1024_v32 = vadd.f32 %v1200_v6, %v1023_v30 }
 0x416   :  { %v1269_v33 = vpack.c.bf16 %v1032_v29, %v1029_v28 }
 0x417   :  { %v1264_v34 = vpack.c.bf16 %v1024_v32, %v1021_v31 }
 0x418   :  { %1285 = vst [vmem:[#allocation11 + $0x28] sm:$0xff] %v1269_v33  }
 0x419   :  { %1284 = vst [vmem:[#allocation11 + $0x20] sm:$0xff] %v1264_v34  }
 0x421   :  { %v1446_v35 = vpop.f32.mrb[44].mxu1 }
 0x422   :  { %v1036_v36 = vpop.f32.mrb[45].mxu1  ;;  %v1045_v38 = vadd.f32 %v1446_v35, %v1200_v6 }
 0x423   :  { %v1447_v37 = vpop.f32.mrb[46].mxu1  ;;  %v1037_v50 = vadd.f32 %v1200_v6, %v1036_v36 }
 0x424   :  { %v1048_v39 = vadd.f32 %v1447_v37, %v1200_v6  ;;  %v1039_v49 = vpop.f32.mrb[47].mxu1 }
 0x425   :  { %v1040_v40 = vadd.f32 %v1200_v6, %v1039_v49 }
 0x426   :  { %v1279_v41 = vpack.c.bf16 %v1048_v39, %v1045_v38 }
 0x427   :  { %v1274_v42 = vpack.c.bf16 %v1040_v40, %v1037_v50 }
 0x428   :  { %1287 = vst [vmem:[#allocation11 + $0x38] sm:$0xff] %v1279_v41  }
 0x429   :  { %1286 = vst [vmem:[#allocation11 + $0x30] sm:$0xff] %v1274_v42  }
 0x42a   :  { %1644 = shalt.err (!%p1641_p2)
}
 0x42b   :  { %s1645_s16 = scalar_lea.hbm %s1894_s9, 1024 }
 0x42c   :  { %p1646_p3 = scmp.ne.s32.totalorder %s1894_s9, %s1645_s16  ;;  %p1649_p4 = scmp.lt.u32.totalorder %s1645_s16, %s1894_s9 }
 0x42e   :  { %p1651_p5 = pnand %p1649_p4, %p1646_p3 }
 0x430   :  { %1654 = shalt.err (!%p1651_p5)
}
 0x431   :  { %1142 = dma.vmem_to_hbm [thread:$0]  %s1137_s12, 1024, %s1894_s9, [#allocation4], %s1668_s10, %s1668_s10, %s1669_s14  }
 0x432   :  { %1661 = dma.done.wait [#allocation4], 1024  }
 0x433   :  { %1662 = vsyncadd [#allocation4], 4294966272 }
 0x434   :  { %1146 = vsyncpa [#allocation3], 1 }
 0x435   :  { %1147 = vsyncpa [#allocation6], 1 }
 0x436   :  { %1148 = vsyncpa [#allocation9], 1 }
 0x437   :  { %1149 = vsyncpa [#allocation4], 1 }

</bundles_post_ra>
